<compile_context>
chip_gen: v6e
topology: v6e:2x2x1
jax: 0.10.0
libtpu: 0.0.40
codegen_flags: <defaults>
</compile_context>

<pallas_src>
import jax
import jax.numpy as jnp
from jax.experimental import pallas as pl
from jax.experimental.pallas import tpu as pltpu
from math import factorial


def combination(m, n):
    return int(factorial(m) // (factorial(n) * factorial(m - n)))


# --- static module configuration (kwargs of StateValue.__init__) -------------
OBS_DIM = 4
DEGREE = 2                                               # default polynomial_degree
NUM_CELL = combination(DEGREE + OBS_DIM - 1, DEGREE)     # = 10 features

# feature-index -> (i, j) pair, in make_features order (i <= j)
_PAIRS = [(i, j) for i in range(OBS_DIM) for j in range(i, OBS_DIM)]
assert len(_PAIRS) == NUM_CELL


# --- Pallas kernel ------------------------------------------------------------
def state_value_kernel(xt_ref, w_ref, o_ref):
    """xt_ref: (D, S, 128) VMEM  -- batch packed sublane+lane dense
       w_ref:  (NUM_CELL,) SMEM  -- norm-folded linear weights
       o_ref:  (S, 128) VMEM     -- lane-dense value output

    Computes the factored quadratic form, fully on the VPU:
        o[s, l] = sum_i x[i, s, l] * ( sum_{j >= i} w'_k * x[j, s, l] )
    One dense store at the end.
    """
    acc = jnp.zeros(o_ref.shape, jnp.float32)
    k = 0
    for i in range(OBS_DIM):
        xi = xt_ref[i]                              # dense (S, 128) slab
        t = xi * w_ref[k]                           # j == i term
        k += 1
        for j in range(i + 1, OBS_DIM):
            t = t + xt_ref[j] * w_ref[k]            # partial weighted sum
            k += 1
        acc = acc + xi * t
    o_ref[...] = acc                                # single unmasked dense store


# --- tile selection -----------------------------------------------------------
def _auto_tile_batch(B):
    """Batch elements per grid step (multiple of 128; S=tb//128 mult. of 8
    whenever more than one grid step is needed)."""
    Bp128 = ((B + 127) // 128) * 128
    if Bp128 <= 1024:
        # Latency regime: one small block, single grid step (block == full array,
        # so the (8,128) divisibility rule does not apply).
        return Bp128
    kind = ""
    try:
        kind = jax.devices()[0].device_kind.lower()
    except Exception:
        pass
    if "v5" in kind:
        pergen = 128 * 1024      # ~2.5 MiB of blocks, fits 16 MiB scoped VMEM
    elif "v6" in kind:
        pergen = 256 * 1024      # ~5 MiB of blocks (x2 double-buffered)
    elif "v7" in kind:
        pergen = 256 * 1024      # 64 MiB VMEM/TC; keep >=2 tiles so both TCs run
    else:
        pergen = 128 * 1024
    Bp1024 = ((B + 1023) // 1024) * 1024            # keep S a multiple of 8
    return min(pergen, Bp1024)


def state_value(obs, norm_matrix, weight, *, tb=None):
    """obs: (B, OBS_DIM) f32, norm_matrix: (OBS_DIM,) f32,
    weight: (NUM_CELL,) or (1, NUM_CELL) f32 (the Linear weight).
    Returns (B, 1) f32, matching the PyTorch module's forward."""
    B, D = obs.shape
    assert D == OBS_DIM

    # Exact constant fold of normalization into the 10 weights:
    #   feature_k = (n_i x_i) * (n_j x_j)  ->  w'_k = w_k * n_i * n_j
    weight = jnp.asarray(weight, jnp.float32).reshape(-1)
    idx_i = jnp.array([p[0] for p in _PAIRS], dtype=jnp.int32)
    idx_j = jnp.array([p[1] for p in _PAIRS], dtype=jnp.int32)
    w_folded = weight * norm_matrix[idx_i] * norm_matrix[idx_j]

    if tb is None:
        tb = _auto_tile_batch(B)
    assert tb % 128 == 0, "batch tile must be a multiple of 128 lanes"
    S = tb // 128
    n_tiles = pl.cdiv(B, tb)
    assert S % 8 == 0 or n_tiles == 1, "sublane block must be mult. of 8 when tiled"
    Bp = n_tiles * tb
    n_sub = Bp // 128

    # Single fused producer chain: pad -> transpose -> repack to (D, n_sub, 128).
    # Padded lanes are zero and are sliced off after the kernel.
    obs_p = jnp.pad(obs.astype(jnp.float32), ((0, Bp - B), (0, 0)))
    xt3 = obs_p.T.reshape(D, n_sub, 128)

    vmem_limit = max(16 << 20, 2 * (D + 1) * tb * 4 + (4 << 20))

    out = pl.pallas_call(
        state_value_kernel,
        out_shape=jax.ShapeDtypeStruct((n_sub, 128), jnp.float32),
        grid=(n_tiles,),
        in_specs=[
            pl.BlockSpec((D, S, 128), lambda b: (0, b, 0)),           # obs slabs
            pl.BlockSpec(memory_space=pltpu.MemorySpace.SMEM),        # folded weights
        ],
        out_specs=pl.BlockSpec((S, 128), lambda b: (b, 0)),
        compiler_params=pltpu.CompilerParams(
            dimension_semantics=("parallel",),                        # megacore / v7x
            vmem_limit_bytes=int(vmem_limit)),
    )(xt3, w_folded)

    return out.reshape(-1)[:B].reshape(B, 1)


# --- pure-JAX reference (mirrors the PyTorch forward, un-folded) ---------------
def state_value_ref(obs, norm_matrix, weight):
    xn = obs.astype(jnp.float32) * norm_matrix[None, :]
    feats = []
    for i in range(OBS_DIM):
        for j in range(i, OBS_DIM):
            feats.append(xn[:, i] * xn[:, j])
    feats = jnp.stack(feats, axis=1)                 # (B, NUM_CELL)
    return feats @ jnp.asarray(weight, jnp.float32).reshape(-1, 1)   # (B, 1)


if __name__ == "__main__":
    key = jax.random.PRNGKey(0)

    # Deterministic parameters (stand in for kwargs 'norm_matrix' / 'initial_weight').
    norm_matrix = jnp.linspace(0.5, 1.5, OBS_DIM, dtype=jnp.float32)
    weight = jnp.linspace(-1.0, 1.0, NUM_CELL, dtype=jnp.float32)

    # 1) Small-batch path (module-default-sized batch): single 128-lane block.
    B_small = 8
    obs_small = jax.random.normal(key, (B_small, OBS_DIM), dtype=jnp.float32)
    out_small = jax.block_until_ready(state_value(obs_small, norm_matrix, weight))
    ref_small = state_value_ref(obs_small, norm_matrix, weight)
    assert out_small.shape == (B_small, 1)
    assert jnp.allclose(out_small, ref_small, atol=1e-5, rtol=1e-5), (out_small, ref_small)

    # 2) Multi-tile path (exercises the grid, ragged last block + padding).
    B_big = 2000
    obs_big = jax.random.normal(jax.random.PRNGKey(1), (B_big, OBS_DIM), dtype=jnp.float32)
    out_big = jax.block_until_ready(state_value(obs_big, norm_matrix, weight, tb=1024))
    ref_big = state_value_ref(obs_big, norm_matrix, weight)
    assert out_big.shape == (B_big, 1)
    assert jnp.allclose(out_big, ref_big, atol=1e-4, rtol=1e-4)

    # TODO(synk): delta_sigma / make_delta_features is not part of forward() and is
    # not implemented as a kernel; only the default degree=2 feature path is covered.

    print("KERNEL_OK")
</pallas_src>

<mosaic_0001>
module attributes {stable_mosaic.version = 11 : i64} {
  func.func @state_value_kernel(%arg0: i32, %arg1: memref<4x1x128xf32, #tpu.memory_space<vmem>>, %arg2: memref<10xf32, #tpu.memory_space<smem>>, %arg3: memref<1x128xf32, #tpu.memory_space<vmem>>) attributes {dimension_semantics = [#tpu.dimension_semantics<parallel>], iteration_bounds = array<i64: 1>, scalar_prefetch = 0 : i64, scratch_operands = 0 : i64, tpu.core_type = #tpu.core_type<tc>, window_params = [{transform_indices = @transform_0, window_bounds = array<i64: 4, 1, 128>}, {transform_indices = @transform_1, window_bounds = array<i64: 10>}, {transform_indices = @transform_2, window_bounds = array<i64: 1, 128>}]} {
    %cst = arith.constant 0.000000e+00 : f32
    %0 = vector.broadcast %cst : f32 to vector<1x128xf32>
    %c0 = arith.constant 0 : index
    %c0_0 = arith.constant 0 : index
    %c0_1 = arith.constant 0 : index
    %1 = vector.load %arg1[%c0, %c0_0, %c0_1] : memref<4x1x128xf32, #tpu.memory_space<vmem>>, vector<1x1x128xf32>
    %2 = vector.shape_cast %1 : vector<1x1x128xf32> to vector<1x128xf32>
    %c0_2 = arith.constant 0 : index
    %3 = memref.load %arg2[%c0_2] : memref<10xf32, #tpu.memory_space<smem>>
    %4 = vector.broadcast %3 : f32 to vector<1x128xf32>
    %5 = arith.mulf %2, %4 : vector<1x128xf32>
    %c1 = arith.constant 1 : index
    %c0_3 = arith.constant 0 : index
    %c0_4 = arith.constant 0 : index
    %6 = vector.load %arg1[%c1, %c0_3, %c0_4] : memref<4x1x128xf32, #tpu.memory_space<vmem>>, vector<1x1x128xf32>
    %7 = vector.shape_cast %6 : vector<1x1x128xf32> to vector<1x128xf32>
    %c1_5 = arith.constant 1 : index
    %8 = memref.load %arg2[%c1_5] : memref<10xf32, #tpu.memory_space<smem>>
    %9 = vector.broadcast %8 : f32 to vector<1x128xf32>
    %10 = arith.mulf %7, %9 : vector<1x128xf32>
    %11 = arith.addf %5, %10 : vector<1x128xf32>
    %c2 = arith.constant 2 : index
    %c0_6 = arith.constant 0 : index
    %c0_7 = arith.constant 0 : index
    %12 = vector.load %arg1[%c2, %c0_6, %c0_7] : memref<4x1x128xf32, #tpu.memory_space<vmem>>, vector<1x1x128xf32>
    %13 = vector.shape_cast %12 : vector<1x1x128xf32> to vector<1x128xf32>
    %c2_8 = arith.constant 2 : index
    %14 = memref.load %arg2[%c2_8] : memref<10xf32, #tpu.memory_space<smem>>
    %15 = vector.broadcast %14 : f32 to vector<1x128xf32>
    %16 = arith.mulf %13, %15 : vector<1x128xf32>
    %17 = arith.addf %11, %16 : vector<1x128xf32>
    %c3 = arith.constant 3 : index
    %c0_9 = arith.constant 0 : index
    %c0_10 = arith.constant 0 : index
    %18 = vector.load %arg1[%c3, %c0_9, %c0_10] : memref<4x1x128xf32, #tpu.memory_space<vmem>>, vector<1x1x128xf32>
    %19 = vector.shape_cast %18 : vector<1x1x128xf32> to vector<1x128xf32>
    %c3_11 = arith.constant 3 : index
    %20 = memref.load %arg2[%c3_11] : memref<10xf32, #tpu.memory_space<smem>>
    %21 = vector.broadcast %20 : f32 to vector<1x128xf32>
    %22 = arith.mulf %19, %21 : vector<1x128xf32>
    %23 = arith.addf %17, %22 : vector<1x128xf32>
    %24 = arith.mulf %2, %23 : vector<1x128xf32>
    %25 = arith.addf %0, %24 : vector<1x128xf32>
    %c1_12 = arith.constant 1 : index
    %c0_13 = arith.constant 0 : index
    %c0_14 = arith.constant 0 : index
    %26 = vector.load %arg1[%c1_12, %c0_13, %c0_14] : memref<4x1x128xf32, #tpu.memory_space<vmem>>, vector<1x1x128xf32>
    %27 = vector.shape_cast %26 : vector<1x1x128xf32> to vector<1x128xf32>
    %c4 = arith.constant 4 : index
    %28 = memref.load %arg2[%c4] : memref<10xf32, #tpu.memory_space<smem>>
    %29 = vector.broadcast %28 : f32 to vector<1x128xf32>
    %30 = arith.mulf %27, %29 : vector<1x128xf32>
    %c2_15 = arith.constant 2 : index
    %c0_16 = arith.constant 0 : index
    %c0_17 = arith.constant 0 : index
    %31 = vector.load %arg1[%c2_15, %c0_16, %c0_17] : memref<4x1x128xf32, #tpu.memory_space<vmem>>, vector<1x1x128xf32>
    %32 = vector.shape_cast %31 : vector<1x1x128xf32> to vector<1x128xf32>
    %c5 = arith.constant 5 : index
    %33 = memref.load %arg2[%c5] : memref<10xf32, #tpu.memory_space<smem>>
    %34 = vector.broadcast %33 : f32 to vector<1x128xf32>
    %35 = arith.mulf %32, %34 : vector<1x128xf32>
    %36 = arith.addf %30, %35 : vector<1x128xf32>
    %c3_18 = arith.constant 3 : index
    %c0_19 = arith.constant 0 : index
    %c0_20 = arith.constant 0 : index
    %37 = vector.load %arg1[%c3_18, %c0_19, %c0_20] : memref<4x1x128xf32, #tpu.memory_space<vmem>>, vector<1x1x128xf32>
    %38 = vector.shape_cast %37 : vector<1x1x128xf32> to vector<1x128xf32>
    %c6 = arith.constant 6 : index
    %39 = memref.load %arg2[%c6] : memref<10xf32, #tpu.memory_space<smem>>
    %40 = vector.broadcast %39 : f32 to vector<1x128xf32>
    %41 = arith.mulf %38, %40 : vector<1x128xf32>
    %42 = arith.addf %36, %41 : vector<1x128xf32>
    %43 = arith.mulf %27, %42 : vector<1x128xf32>
    %44 = arith.addf %25, %43 : vector<1x128xf32>
    %c2_21 = arith.constant 2 : index
    %c0_22 = arith.constant 0 : index
    %c0_23 = arith.constant 0 : index
    %45 = vector.load %arg1[%c2_21, %c0_22, %c0_23] : memref<4x1x128xf32, #tpu.memory_space<vmem>>, vector<1x1x128xf32>
    %46 = vector.shape_cast %45 : vector<1x1x128xf32> to vector<1x128xf32>
    %c7 = arith.constant 7 : index
    %47 = memref.load %arg2[%c7] : memref<10xf32, #tpu.memory_space<smem>>
    %48 = vector.broadcast %47 : f32 to vector<1x128xf32>
    %49 = arith.mulf %46, %48 : vector<1x128xf32>
    %c3_24 = arith.constant 3 : index
    %c0_25 = arith.constant 0 : index
    %c0_26 = arith.constant 0 : index
    %50 = vector.load %arg1[%c3_24, %c0_25, %c0_26] : memref<4x1x128xf32, #tpu.memory_space<vmem>>, vector<1x1x128xf32>
    %51 = vector.shape_cast %50 : vector<1x1x128xf32> to vector<1x128xf32>
    %c8 = arith.constant 8 : index
    %52 = memref.load %arg2[%c8] : memref<10xf32, #tpu.memory_space<smem>>
    %53 = vector.broadcast %52 : f32 to vector<1x128xf32>
    %54 = arith.mulf %51, %53 : vector<1x128xf32>
    %55 = arith.addf %49, %54 : vector<1x128xf32>
    %56 = arith.mulf %46, %55 : vector<1x128xf32>
    %57 = arith.addf %44, %56 : vector<1x128xf32>
    %c3_27 = arith.constant 3 : index
    %c0_28 = arith.constant 0 : index
    %c0_29 = arith.constant 0 : index
    %58 = vector.load %arg1[%c3_27, %c0_28, %c0_29] : memref<4x1x128xf32, #tpu.memory_space<vmem>>, vector<1x1x128xf32>
    %59 = vector.shape_cast %58 : vector<1x1x128xf32> to vector<1x128xf32>
    %c9 = arith.constant 9 : index
    %60 = memref.load %arg2[%c9] : memref<10xf32, #tpu.memory_space<smem>>
    %61 = vector.broadcast %60 : f32 to vector<1x128xf32>
    %62 = arith.mulf %59, %61 : vector<1x128xf32>
    %63 = arith.mulf %59, %62 : vector<1x128xf32>
    %64 = arith.addf %57, %63 : vector<1x128xf32>
    %c0_30 = arith.constant 0 : index
    %c0_31 = arith.constant 0 : index
    %65 = vector.load %arg3[%c0_30, %c0_31] : memref<1x128xf32, #tpu.memory_space<vmem>>, vector<1x128xf32>
    tpu.vector_store %arg3[%c0_30, %c0_31], %64 {strides = array<i32>} : memref<1x128xf32, #tpu.memory_space<vmem>>, vector<1x128xf32>,
    return
  }
  func.func @transform_0(%arg0: i32) -> (i32, i32, i32) {
    %c0_i32 = arith.constant 0 : i32
    %c0_i32_0 = arith.constant 0 : i32
    %c0_i32_1 = arith.constant 0 : i32
    return %c0_i32, %arg0, %c0_i32_0 : i32, i32, i32
  }
  func.func @transform_1(%arg0: i32) -> i32 {
    %c0_i32 = arith.constant 0 : i32
    %c0_i32_0 = arith.constant 0 : i32
    return %c0_i32 : i32
  }
  func.func @transform_2(%arg0: i32) -> (i32, i32) {
    %c0_i32 = arith.constant 0 : i32
    %c0_i32_0 = arith.constant 0 : i32
    return %arg0, %c0_i32 : i32, i32
  }
}

</mosaic_0001>

<bundles_post_ra>
// kernel: tpu_custom_call.1
= control target key start
LH: loop header
LB: loop body
LE: loop exit
PB: predicated region body
PF: predicated region fallthrough
CT: control target
= control target key end

     0   :  { %7 = vsyncpa [#allocation3], 0  ;;  %s208_s0 = inlined_call_operand.hbm [shape: f32[4,1,128], index: 0, kind: input, shape index: {}]   ;;  %s209_s1 = inlined_call_operand.vmem [shape: f32[10], index: 1, kind: input, shape index: {}]   ;;  %s210_s2 = inlined_call_operand.hbm [shape: f32[1,128], index: 2, kind: output, shape index: {}]  }
   0x1   :  { %8 = vsyncpa [#allocation5], 0 }
   0x2   :  { %9 = vsyncpa [#allocation4], 0  ;;  %s179_s9 = smov [#allocation2]   ;;  %s28_s13 = sshll.u32 %s209_s1, 4  ;;  %s29_s13 = int_to_ptr.vmem [resolvable:$true] %s28_s13 }
   0x3   :  { %s15_s10 = sshll.u32 %s179_s9, 4  ;;  %s16_s10 = int_to_ptr.vmem [resolvable:$true] %s15_s10 }
   0x4   :  { %s129_s14 = scalar_lea.vmem %s16_s10, 64  ;;  %p134_p1 = scmp.lt.s32.totalorder %s16_s10, %s16_s10 }
   0x5   :  { %p130_p0 = scmp.ne.s32.totalorder %s16_s10, %s129_s14  ;;  %p135_p2 = scmp.lt.s32.totalorder %s129_s14, %s129_s14 }
   0x7   :  { %p136_p3 = por %p135_p2, %p134_p1 }
   0x9   :  { %p137_p4 = pnand %p136_p3, %p130_p0 }
   0xb   :  { %140 = shalt.err (!%p137_p4)
}
   0xc   :  { %s180_s15 = smov 16   ;;  %s181_s16 = smov 1  }
   0xd   :  { %21 = dma.hbm_to_vmem [thread:$0]  %s208_s0, 64, %s16_s10, [#allocation3], %s180_s15, %s180_s15, %s181_s16  }
   0xe   :  { %s141_s19 = scalar_lea.vmem %s29_s13, 16  ;;  %p146_p6 = scmp.lt.s32.totalorder %s29_s13, %s29_s13 }
   0xf   :  { %p142_p5 = scmp.ne.s32.totalorder %s29_s13, %s141_s19  ;;  %p147_p7 = scmp.lt.s32.totalorder %s141_s19, %s141_s19 }
  0x11   :  { %p148_p8 = por %p147_p7, %p146_p6 }
  0x13   :  { %p149_p9 = pnand %p148_p8, %p142_p5 }
  0x15   :  { %152 = shalt.err (!%p149_p9)
}
  0x16   :  { %s182_s1 = smov [#allocation6]  }
  0x17   :  { %31 = dma.vmem_to_smem %s29_s13, 16, %s182_s1, [#allocation5]  }
  0x18   :  { %173 = dma.done.wait [#allocation3], 64  }
  0x19   :  { %174 = vsyncadd [#allocation3], 4294967232 }
  0x1a   :  { %175 = dma.done.wait [#allocation5], 16  }
  0x1b   :  { %176 = vsyncadd [#allocation5], 4294967280 }
  0x1c   :  { %38 = sfence }
  0x1d   :  { %s40_s20 = sld [smem:[#allocation6]]  ;;  %v39_v0 = vld [vmem:[#allocation2] sm:$0x1]  ;;  %v44_v1 = vld [vmem:[#allocation2 + $0x1] sm:$0x1]  ;;  %s183_s29 = smov [#allocation7]  }
  0x1e   :  { %s107_s21 = sld [smem:[#allocation6 + $0x1]]  ;;  %v50_v3 = vld [vmem:[#allocation2 + $0x2] sm:$0x1]  ;;  %v56_v6 = vld [vmem:[#allocation2 + $0x3] sm:$0x1]  ;;  %s97_s30 = sshll.u32 %s183_s29, 4  ;;  %s98_s30 = int_to_ptr.vmem [resolvable:$true] %s97_s30 }
  0x1f   :  { %s108_s22 = sld [smem:[#allocation6 + $0x2]]  ;;  %s153_s3 = scalar_lea.vmem %s98_s30, 16 }
  0x20   :  { %s109_s23 = sld [smem:[#allocation6 + $0x3]]  ;;  %p154_p10 = scmp.ne.s32.totalorder %s98_s30, %s153_s3 }
  0x21   :  { %s110_s0 = sld [smem:[#allocation6 + $0x4]]  ;;  %s157_s4 = scalar_lea.vmem %s98_s30, 32 }
  0x22   :  { %s111_s24 = sld [smem:[#allocation6 + $0x5]]  ;;  %p158_p11 = scmp.lt.s32.totalorder %s98_s30, %s98_s30 }
  0x23   :  { %v41_v2 = vstv %s40_s20  ;;  %s112_s25 = sld [smem:[#allocation6 + $0x6]]  ;;  %p159_p12 = scmp.lt.s32.totalorder %s157_s4, %s153_s3 }
  0x24   :  { %v42_v4 = vmul.f32 %v41_v2, %v39_v0  ;;  %v46_v5 = vstv %s107_s21  ;;  %s113_s26 = sld [smem:[#allocation6 + $0x7]] }
  0x25   :  { %v47_v7 = vmul.f32 %v46_v5, %v44_v1  ;;  %v52_v8 = vstv %s108_s22  ;;  %s114_s27 = sld [smem:[#allocation6 + $0x8]]  ;;  %p160_p13 = por %p159_p12, %p158_p11 }
  0x26   :  { %v53_v9 = vmul.f32 %v52_v8, %v50_v3  ;;  %v58_v10 = vstv %s109_s23  ;;  %s115_s28 = sld [smem:[#allocation6 + $0x9]] }
  0x27   :  { %v48_v11 = vadd.f32 %v47_v7, %v42_v4  ;;  %v59_v12 = vmul.f32 %v58_v10, %v56_v6  ;;  %v64_v13 = vstv %s110_s0  ;;  %p161_p0 = pnand %p160_p13, %p154_p10 }
  0x28   :  { %v65_v14 = vmul.f32 %v64_v13, %v44_v1  ;;  %v67_v15 = vstv %s111_s24 }
  0x29   :  { %v54_v16 = vadd.f32 %v53_v9, %v48_v11  ;;  %v68_v17 = vmul.f32 %v67_v15, %v50_v3  ;;  %v71_v18 = vstv %s112_s25 }
  0x2a   :  { %v72_v19 = vmul.f32 %v71_v18, %v56_v6  ;;  %v77_v20 = vstv %s113_s26 }
  0x2b   :  { %v60_v21 = vadd.f32 %v59_v12, %v54_v16  ;;  %v69_v22 = vadd.f32 %v68_v17, %v65_v14  ;;  %v78_v23 = vmul.f32 %v77_v20, %v50_v3  ;;  %v80_v24 = vstv %s114_s27 }
  0x2c   :  { %v81_v25 = vmul.f32 %v80_v24, %v56_v6  ;;  %v86_v26 = vstv %s115_s28 }
  0x2d   :  { %v61_v27 = vmul.f32 %v60_v21, %v39_v0  ;;  %v73_v28 = vadd.f32 %v72_v19, %v69_v22  ;;  %v87_v29 = vmul.f32 %v86_v26, %v56_v6 }
  0x2e   :  { %v82_v30 = vadd.f32 %v81_v25, %v78_v23 }
  0x2f   :  { %v74_v31 = vmul.f32 %v73_v28, %v44_v1  ;;  %v88_v34 = vmul.f32 %v87_v29, %v56_v6 }
  0x30   :  { %v83_v32 = vmul.f32 %v82_v30, %v50_v3 }
  0x31   :  { %v75_v33 = vadd.f32 %v74_v31, %v61_v27 }
  0x33   :  { %v84_v35 = vadd.f32 %v83_v32, %v75_v33 }
  0x35   :  { %v89_v36 = vadd.f32 %v88_v34, %v84_v35 }
  0x37   :  { %90 = vst [vmem:[#allocation7] sm:$0x1] %v89_v36 }
  0x38   :  { %164 = shalt.err (!%p161_p0)
}
  0x39   :  { %100 = dma.vmem_to_hbm [thread:$0]  %s98_s30, 16, %s210_s2, [#allocation4]  }
  0x3a   :  { %177 = dma.done.wait [#allocation4], 16  }
  0x3b   :  { %178 = vsyncadd [#allocation4], 4294967280 }
  0x3c   :  { %104 = vsyncpa [#allocation3], 1 }
  0x3d   :  { %105 = vsyncpa [#allocation4], 1 }
  0x3e   :  { %106 = vsyncpa [#allocation5], 1 }

</bundles_post_ra>
